<compile_context>
chip_gen: v7x
topology: tpu7x:2x2x1
jax: 0.10.0
libtpu: 0.0.40
codegen_flags: <defaults>
</compile_context>

<pallas_src>
from functools import partial

import jax
import jax.numpy as jnp
from jax.experimental import pallas as pl
from jax.experimental.pallas import tpu as pltpu

LANE = 128
MiB = 1024 * 1024


def _round_up(n, m):
    return ((n + m - 1) // m) * m


# ----------------------------- fused kernel ---------------------------------
def a2c_fused_kernel(x_ref, w1_ref, b1_ref, w2_ref, b2_ref, w3_ref, b3_ref, out_ref):
    # Layers 1-2: bf16 MXU inputs, f32 accumulation; bias add + ReLU stay in f32.
    x = x_ref[...].astype(jnp.bfloat16)

    h = jnp.dot(x, w1_ref[...], preferred_element_type=jnp.float32) + b1_ref[...]
    h = jnp.maximum(h, 0.0).astype(jnp.bfloat16)

    h = jnp.dot(h, w2_ref[...], preferred_element_type=jnp.float32) + b2_ref[...]
    h = jnp.maximum(h, 0.0)  # stays f32 into the final layer

    # Final layer in f32 (weights kept f32) for value-head accuracy; lane-dense
    # (TILE_B, 128) store: policy logits in cols [0:A], value in col [A], zeros elsewhere.
    out = jnp.dot(h, w3_ref[...], preferred_element_type=jnp.float32) + b3_ref[...]
    out_ref[...] = out.astype(out_ref.dtype)


# --------------------------- parameter packing -------------------------------
def pack_a2c_params(policy_params, value_params):
    """Fuse the two 3-layer ReLU MLP heads into one block-diagonal stacked MLP.

    policy_params / value_params: (W1, b1, W2, b2, W3, b3) with W stored (in, out).
    Returns bf16 W1/W2, f32 W3 and biases, plus the real policy/value output widths.
    """
    w1p, b1p, w2p, b2p, w3p, b3p = policy_params
    w1v, b1v, w2v, b2v, w3v, b3v = value_params

    hp, hv = w1p.shape[1], w1v.shape[1]
    h2 = hp + hv
    out_p, out_v = w3p.shape[1], w3v.shape[1]
    out_pad = _round_up(out_p + out_v, LANE)

    w1 = jnp.concatenate([w1p, w1v], axis=1)                      # (STATE, 2H)
    b1 = jnp.concatenate([b1p, b1v], axis=1)                      # (1, 2H)

    w2 = jnp.zeros((h2, h2), jnp.float32)
    w2 = w2.at[:hp, :hp].set(w2p).at[hp:, hp:].set(w2v)           # block-diagonal (2H, 2H)
    b2 = jnp.concatenate([b2p, b2v], axis=1)                      # (1, 2H)

    w3 = jnp.zeros((h2, out_pad), jnp.float32)
    w3 = w3.at[:hp, :out_p].set(w3p)
    w3 = w3.at[hp:, out_p:out_p + out_v].set(w3v)                 # (2H, 128), kept f32
    b3 = jnp.zeros((1, out_pad), jnp.float32)
    b3 = b3.at[:, :out_p].set(b3p)
    b3 = b3.at[:, out_p:out_p + out_v].set(b3v)                   # (1, 128)

    return (w1.astype(jnp.bfloat16), b1,
            w2.astype(jnp.bfloat16), b2,
            w3, b3,
            out_p, out_v)


# ------------------------------ forward pass ---------------------------------
def _vmem_limit(tile, s, out_pad, x_itemsize, out_itemsize, weight_bytes):
    """Tight VMEM limit from actual block sizes (double-buffered x/out, resident weights,
    generous allowance for in-body intermediates), with 1.5x margin, capped below the
    64 MiB physical VMEM of v7x."""
    x_blk = tile * s * x_itemsize
    out_blk = tile * out_pad * out_itemsize
    inter = 4 * tile * out_pad * 4
    est = 2 * x_blk + 2 * out_blk + 2 * weight_bytes + inter
    return int(min(max(3 * est // 2, 16 * MiB), 50 * MiB))


@partial(jax.jit, static_argnames=("out_p", "out_v", "tile_b", "out_dtype"))
def _a2c_forward_impl(state, w1, b1, w2, b2, w3, b3, *, out_p, out_v, tile_b, out_dtype):
    B, S = state.shape
    out_pad = w3.shape[1]

    # Batch tile: multiple of 8 sublanes, capped at ceil(B/2) so the grid has >= 2 steps
    # whenever B allows it (both v7x TensorCores get work via the "parallel" axis).
    half = _round_up(pl.cdiv(B, 2), 8)
    tile = max(8, min(_round_up(tile_b, 8), half, _round_up(B, 8)))
    grid = (pl.cdiv(B, tile),)

    weight_bytes = sum(int(a.size) * a.dtype.itemsize for a in (w1, b1, w2, b2, w3, b3))
    vmem_bytes = _vmem_limit(tile, S, out_pad,
                             state.dtype.itemsize, jnp.dtype(out_dtype).itemsize,
                             weight_bytes)

    def full_spec(arr):
        nd = arr.ndim
        return pl.BlockSpec(arr.shape, lambda i, _nd=nd: (0,) * _nd)  # resident weights

    q_pad = pl.pallas_call(
        a2c_fused_kernel,
        out_shape=jax.ShapeDtypeStruct((B, out_pad), out_dtype),
        grid=grid,
        in_specs=[
            pl.BlockSpec((tile, S), lambda i: (i, 0)),     # x: tiled over batch
            full_spec(w1), full_spec(b1),
            full_spec(w2), full_spec(b2),
            full_spec(w3), full_spec(b3),
        ],
        out_specs=pl.BlockSpec((tile, out_pad), lambda i: (i, 0)),
        compiler_params=pltpu.CompilerParams(
            dimension_semantics=("parallel",),             # megacore / v7x 2-TC sharding
            vmem_limit_bytes=vmem_bytes,
        ),
    )(state, w1, b1, w2, b2, w3, b3)

    # Jitted together with the pallas_call so these slices don't force extra eager HBM passes.
    policy = q_pad[:, :out_p]
    value = q_pad[:, out_p:out_p + out_v]
    return policy, value


def a2c_forward(state, packed, *, tile_b=4096, out_dtype=jnp.float32):
    """state: (B, STATE), f32 or bf16. Returns (policy_logits (B, A), value (B, 1)).

    tile_b: batch tile cap (default 4096; up to 8192 is fine on 128 MiB-VMEM parts).
    out_dtype: dtype of the kernel's output slab; bf16 halves the dominant HBM write.
    """
    w1, b1, w2, b2, w3, b3, out_p, out_v = packed
    return _a2c_forward_impl(state, w1, b1, w2, b2, w3, b3,
                             out_p=out_p, out_v=out_v, tile_b=tile_b, out_dtype=out_dtype)


# ------------------------- init + pure-JAX reference -------------------------
def init_linear(key, in_features, out_features):
    """nn.Linear-style uniform(-1/sqrt(fan_in), 1/sqrt(fan_in)); stored (in, out)."""
    kw, kb = jax.random.split(key)
    bound = 1.0 / jnp.sqrt(jnp.float32(in_features))
    w = jax.random.uniform(kw, (in_features, out_features), jnp.float32, -bound, bound)
    b = jax.random.uniform(kb, (1, out_features), jnp.float32, -bound, bound)
    return w, b


def build_mlp_params(key, layer_sizes):
    params = []
    keys = jax.random.split(key, len(layer_sizes) - 1)
    for k, (fi, fo) in zip(keys, zip(layer_sizes[:-1], layer_sizes[1:])):
        w, b = init_linear(k, fi, fo)
        params.extend([w, b])
    return tuple(params)


def reference_forward(state, policy_params, value_params):
    """Pure-JAX f32 reference of A2CNetLinear.forward: (policy(x), value(x))."""
    x = state.astype(jnp.float32)

    def mlp(x, p):
        w1, b1, w2, b2, w3, b3 = p
        h = jnp.maximum(x @ w1 + b1, 0.0)
        h = jnp.maximum(h @ w2 + b2, 0.0)
        return h @ w3 + b3

    return mlp(x, policy_params), mlp(x, value_params)


if __name__ == "__main__":
    STATE = 32
    HIDDEN = 64        # fused hidden = 2*HIDDEN = 128 -> full MXU lane width
    N_ACTIONS = 8
    BATCH = 8

    root = jax.random.PRNGKey(0)
    k_state, k_pol, k_val = jax.random.split(root, 3)

    state = jax.random.normal(k_state, (BATCH, STATE), jnp.float32)

    # policy_net_cfg = [STATE, HIDDEN, 'relu', HIDDEN, 'relu', N_ACTIONS]
    policy_params = build_mlp_params(k_pol, [STATE, HIDDEN, HIDDEN, N_ACTIONS])
    # value_net_cfg  = [STATE, HIDDEN, 'relu', HIDDEN, 'relu', 1]
    value_params = build_mlp_params(k_val, [STATE, HIDDEN, HIDDEN, 1])

    packed = pack_a2c_params(policy_params, value_params)

    policy, value = a2c_forward(state, packed)
    policy = jax.block_until_ready(policy)
    value = jax.block_until_ready(value)

    p_ref, v_ref = reference_forward(state, policy_params, value_params)

    assert policy.shape == (BATCH, N_ACTIONS)
    assert value.shape == (BATCH, 1)
    # bf16 matmul inputs in layers 1-2 (f32 accumulation, f32 final layer) vs the
    # f32 PyTorch-style reference.
    assert jnp.allclose(policy, p_ref, atol=3e-2, rtol=3e-2), "policy mismatch vs reference"
    assert jnp.allclose(value, v_ref, atol=3e-2, rtol=3e-2), "value mismatch vs reference"

    # Second small check: batch not a multiple of the tile -> 2 grid steps + partial last block.
    state2 = jax.random.normal(jax.random.PRNGKey(1), (20, STATE), jnp.float32)
    p2, v2 = a2c_forward(state2, packed)
    p2 = jax.block_until_ready(p2)
    v2 = jax.block_until_ready(v2)
    p2_ref, v2_ref = reference_forward(state2, policy_params, value_params)
    assert p2.shape == (20, N_ACTIONS) and v2.shape == (20, 1)
    assert jnp.allclose(p2, p2_ref, atol=3e-2, rtol=3e-2), "policy mismatch (partial tile)"
    assert jnp.allclose(v2, v2_ref, atol=3e-2, rtol=3e-2), "value mismatch (partial tile)"

    print("KERNEL_OK")
</pallas_src>

<mosaic_0001>
module attributes {stable_mosaic.version = 11 : i64} {
  func.func @a2c_fused_kernel(%arg0: i32, %arg1: memref<8x32xf32, #tpu.memory_space<vmem>>, %arg2: memref<32x128xbf16, #tpu.memory_space<vmem>>, %arg3: memref<1x128xf32, #tpu.memory_space<vmem>>, %arg4: memref<128x128xbf16, #tpu.memory_space<vmem>>, %arg5: memref<1x128xf32, #tpu.memory_space<vmem>>, %arg6: memref<128x128xf32, #tpu.memory_space<vmem>>, %arg7: memref<1x128xf32, #tpu.memory_space<vmem>>, %arg8: memref<8x128xf32, #tpu.memory_space<vmem>>) attributes {dimension_semantics = [#tpu.dimension_semantics<parallel>], iteration_bounds = array<i64: 1>, scalar_prefetch = 0 : i64, scratch_operands = 0 : i64, tpu.core_type = #tpu.core_type<tc>, window_params = [{transform_indices = @transform_0, window_bounds = array<i64: 8, 32>}, {pipeline_mode = #tpu.pipeline_mode<synchronous>, transform_indices = @transform_1, window_bounds = array<i64: 32, 128>}, {pipeline_mode = #tpu.pipeline_mode<synchronous>, transform_indices = @transform_2, window_bounds = array<i64: 1, 128>}, {pipeline_mode = #tpu.pipeline_mode<synchronous>, transform_indices = @transform_3, window_bounds = array<i64: 128, 128>}, {pipeline_mode = #tpu.pipeline_mode<synchronous>, transform_indices = @transform_4, window_bounds = array<i64: 1, 128>}, {pipeline_mode = #tpu.pipeline_mode<synchronous>, transform_indices = @transform_5, window_bounds = array<i64: 128, 128>}, {pipeline_mode = #tpu.pipeline_mode<synchronous>, transform_indices = @transform_6, window_bounds = array<i64: 1, 128>}, {transform_indices = @transform_7, window_bounds = array<i64: 8, 128>}]} {
    %c0 = arith.constant 0 : index
    %c0_0 = arith.constant 0 : index
    %0 = vector.load %arg1[%c0, %c0_0] : memref<8x32xf32, #tpu.memory_space<vmem>>, vector<8x32xf32>
    %1 = arith.truncf %0 : vector<8x32xf32> to vector<8x32xbf16>
    %c0_1 = arith.constant 0 : index
    %c0_2 = arith.constant 0 : index
    %2 = vector.load %arg2[%c0_1, %c0_2] : memref<32x128xbf16, #tpu.memory_space<vmem>>, vector<32x128xbf16>
    %cst = arith.constant dense<0.000000e+00> : vector<8x128xf32>
    %3 = tpu.matmul %1, %2, %cst {dimension_numbers = #tpu.dot_dimension_numbers<[1], [0], [0], [1], [0, 0, 1, 1], [], []>} : vector<8x32xbf16>, vector<32x128xbf16>, vector<8x128xf32> -> vector<8x128xf32>
    %c0_3 = arith.constant 0 : index
    %c0_4 = arith.constant 0 : index
    %4 = vector.load %arg3[%c0_3, %c0_4] : memref<1x128xf32, #tpu.memory_space<vmem>>, vector<1x128xf32>
    %5 = vector.broadcast %4 : vector<1x128xf32> to vector<8x128xf32>
    %6 = arith.addf %3, %5 : vector<8x128xf32>
    %cst_5 = arith.constant 0.000000e+00 : f32
    %7 = vector.broadcast %cst_5 : f32 to vector<8x128xf32>
    %8 = arith.maximumf %6, %7 : vector<8x128xf32>
    %9 = arith.truncf %8 : vector<8x128xf32> to vector<8x128xbf16>
    %c0_6 = arith.constant 0 : index
    %c0_7 = arith.constant 0 : index
    %10 = vector.load %arg4[%c0_6, %c0_7] : memref<128x128xbf16, #tpu.memory_space<vmem>>, vector<128x128xbf16>
    %cst_8 = arith.constant dense<0.000000e+00> : vector<8x128xf32>
    %11 = tpu.matmul %9, %10, %cst_8 {dimension_numbers = #tpu.dot_dimension_numbers<[1], [0], [0], [1], [0, 0, 1, 1], [], []>} : vector<8x128xbf16>, vector<128x128xbf16>, vector<8x128xf32> -> vector<8x128xf32>
    %c0_9 = arith.constant 0 : index
    %c0_10 = arith.constant 0 : index
    %12 = vector.load %arg5[%c0_9, %c0_10] : memref<1x128xf32, #tpu.memory_space<vmem>>, vector<1x128xf32>
    %13 = vector.broadcast %12 : vector<1x128xf32> to vector<8x128xf32>
    %14 = arith.addf %11, %13 : vector<8x128xf32>
    %cst_11 = arith.constant 0.000000e+00 : f32
    %15 = vector.broadcast %cst_11 : f32 to vector<8x128xf32>
    %16 = arith.maximumf %14, %15 : vector<8x128xf32>
    %c0_12 = arith.constant 0 : index
    %c0_13 = arith.constant 0 : index
    %17 = vector.load %arg6[%c0_12, %c0_13] : memref<128x128xf32, #tpu.memory_space<vmem>>, vector<128x128xf32>
    %cst_14 = arith.constant dense<0.000000e+00> : vector<8x128xf32>
    %18 = tpu.matmul %16, %17, %cst_14 {dimension_numbers = #tpu.dot_dimension_numbers<[1], [0], [0], [1], [0, 0, 1, 1], [], []>} : vector<8x128xf32>, vector<128x128xf32>, vector<8x128xf32> -> vector<8x128xf32>
    %c0_15 = arith.constant 0 : index
    %c0_16 = arith.constant 0 : index
    %19 = vector.load %arg7[%c0_15, %c0_16] : memref<1x128xf32, #tpu.memory_space<vmem>>, vector<1x128xf32>
    %20 = vector.broadcast %19 : vector<1x128xf32> to vector<8x128xf32>
    %21 = arith.addf %18, %20 : vector<8x128xf32>
    %c0_17 = arith.constant 0 : index
    %c0_18 = arith.constant 0 : index
    %22 = vector.load %arg8[%c0_17, %c0_18] : memref<8x128xf32, #tpu.memory_space<vmem>>, vector<8x128xf32>
    tpu.vector_store %arg8[%c0_17, %c0_18], %21 {strides = array<i32>} : memref<8x128xf32, #tpu.memory_space<vmem>>, vector<8x128xf32>,
    return
  }
  func.func @transform_0(%arg0: i32) -> (i32, i32) {
    %c0_i32 = arith.constant 0 : i32
    %c0_i32_0 = arith.constant 0 : i32
    return %arg0, %c0_i32 : i32, i32
  }
  func.func @transform_1(%arg0: i32) -> (i32, i32) {
    %c0_i32 = arith.constant 0 : i32
    %c0_i32_0 = arith.constant 0 : i32
    %c0_i32_1 = arith.constant 0 : i32
    return %c0_i32, %c0_i32_0 : i32, i32
  }
  func.func @transform_2(%arg0: i32) -> (i32, i32) {
    %c0_i32 = arith.constant 0 : i32
    %c0_i32_0 = arith.constant 0 : i32
    %c0_i32_1 = arith.constant 0 : i32
    return %c0_i32, %c0_i32_0 : i32, i32
  }
  func.func @transform_3(%arg0: i32) -> (i32, i32) {
    %c0_i32 = arith.constant 0 : i32
    %c0_i32_0 = arith.constant 0 : i32
    %c0_i32_1 = arith.constant 0 : i32
    return %c0_i32, %c0_i32_0 : i32, i32
  }
  func.func @transform_4(%arg0: i32) -> (i32, i32) {
    %c0_i32 = arith.constant 0 : i32
    %c0_i32_0 = arith.constant 0 : i32
    %c0_i32_1 = arith.constant 0 : i32
    return %c0_i32, %c0_i32_0 : i32, i32
  }
  func.func @transform_5(%arg0: i32) -> (i32, i32) {
    %c0_i32 = arith.constant 0 : i32
    %c0_i32_0 = arith.constant 0 : i32
    %c0_i32_1 = arith.constant 0 : i32
    return %c0_i32, %c0_i32_0 : i32, i32
  }
  func.func @transform_6(%arg0: i32) -> (i32, i32) {
    %c0_i32 = arith.constant 0 : i32
    %c0_i32_0 = arith.constant 0 : i32
    %c0_i32_1 = arith.constant 0 : i32
    return %c0_i32, %c0_i32_0 : i32, i32
  }
  func.func @transform_7(%arg0: i32) -> (i32, i32) {
    %c0_i32 = arith.constant 0 : i32
    %c0_i32_0 = arith.constant 0 : i32
    return %arg0, %c0_i32 : i32, i32
  }
}

</mosaic_0001>

<bundles_post_ra>
// kernel: _a2c_forward_impl.1
= control target key start
LH: loop header
LB: loop body
LE: loop exit
PB: predicated region body
PF: predicated region fallthrough
CT: control target
= control target key end

     0   :  { %12 = vsyncpa [#allocation3], 0  ;;  %s729_s0 = inlined_call_operand.hbm [shape: f32[8,32], index: 0, kind: input, shape index: {}]   ;;  %s730_s1 = inlined_call_operand.hbm [shape: bf16[32,128], index: 1, kind: input, shape index: {}]   ;;  %s731_s2 = inlined_call_operand.vmem [shape: f32[1,128], index: 2, kind: input, shape index: {}]   ;;  %s732_s3 = inlined_call_operand.hbm [shape: bf16[128,128], index: 3, kind: input, shape index: {}]   ;;  %s733_s4 = inlined_call_operand.vmem [shape: f32[1,128], index: 4, kind: input, shape index: {}]   ;;  %s734_s5 = inlined_call_operand.hbm [shape: f32[128,128], index: 5, kind: input, shape index: {}]   ;;  %s735_s6 = inlined_call_operand.vmem [shape: f32[1,128], index: 6, kind: input, shape index: {}]   ;;  %s736_s7 = inlined_call_operand.vmem [shape: f32[8,128], index: 7, kind: output, shape index: {}]  }
   0x1   :  { %13 = vsyncpa [#allocation5], 0 }
   0x2   :  { %14 = vsyncpa [#allocation8], 0  ;;  %s609_s24 = smov [#allocation4]   ;;  %s515_s28 = scalar_lea.hbm %s730_s1, 256 }
   0x3   :  { %s30_s25 = sshll.u32 %s609_s24, 4  ;;  %p516_p0 = scmp.ne.s32.totalorder %s730_s1, %s515_s28  ;;  %s31_s25 = int_to_ptr.vmem [resolvable:$true] %s30_s25 }
   0x4   :  { %p519_p1 = scmp.lt.u32.totalorder %s515_s28, %s730_s1 }
   0x6   :  { %p521_p2 = pnand %p519_p1, %p516_p0 }
   0x8   :  { %524 = shalt.err (!%p521_p2)
}
   0x9   :  { %s525_s10 = scalar_lea.vmem %s31_s25, 256  ;;  %p530_p4 = scmp.lt.s32.totalorder %s31_s25, %s31_s25 }
   0xa   :  { %p526_p3 = scmp.ne.s32.totalorder %s31_s25, %s525_s10  ;;  %p531_p5 = scmp.lt.s32.totalorder %s525_s10, %s525_s10 }
   0xc   :  { %p532_p6 = por %p531_p5, %p530_p4 }
   0xe   :  { %p533_p7 = pnand %p532_p6, %p526_p3 }
  0x10   :  { %536 = shalt.err (!%p533_p7)
}
  0x11   :  { %s610_s11 = smov 64   ;;  %s611_s12 = smov 4  }
  0x12   :  { %36 = dma.hbm_to_vmem [thread:$0]  %s730_s1, 256, %s31_s25, [#allocation5], %s610_s11, %s610_s11, %s611_s12  }
  0x13   :  { %s612_s15 = smov [#allocation2]   ;;  %s613_s17 = smov [#allocation6]  }
  0x14   :  { %s21_s16 = sshll.u32 %s612_s15, 4  ;;  %s44_s18 = sshll.u32 %s613_s17, 4  ;;  %s22_s16 = int_to_ptr.vmem [resolvable:$true] %s21_s16  ;;  %s45_s18 = int_to_ptr.vmem [resolvable:$true] %s44_s18 }
  0x15   :  { %s537_s21 = scalar_lea.hbm %s729_s0, 128 }
  0x16   :  { %p538_p8 = scmp.ne.s32.totalorder %s729_s0, %s537_s21  ;;  %p541_p9 = scmp.lt.u32.totalorder %s537_s21, %s729_s0 }
  0x18   :  { %p543_p10 = pnand %p541_p9, %p538_p8 }
  0x1a   :  { %546 = shalt.err (!%p543_p10)
}
  0x1b   :  { %s547_s1 = scalar_lea.vmem %s22_s16, 128  ;;  %p552_p12 = scmp.lt.s32.totalorder %s22_s16, %s22_s16 }
  0x1c   :  { %p548_p11 = scmp.ne.s32.totalorder %s22_s16, %s547_s1  ;;  %p553_p13 = scmp.lt.s32.totalorder %s547_s1, %s547_s1 }
  0x1e   :  { %p554_p0 = por %p553_p13, %p552_p12 }
  0x20   :  { %p555_p1 = pnand %p554_p0, %p548_p11 }
  0x22   :  { %558 = shalt.err (!%p555_p1)
}
  0x23   :  { %24 = dma.hbm_to_vmem [thread:$0]  %s729_s0, 128, %s22_s16, [#allocation3]  }
  0x24   :  { %s559_s30 = scalar_lea.hbm %s732_s3, 1024 }
  0x25   :  { %p560_p2 = scmp.ne.s32.totalorder %s732_s3, %s559_s30  ;;  %p563_p3 = scmp.lt.u32.totalorder %s559_s30, %s732_s3 }
  0x27   :  { %p565_p4 = pnand %p563_p3, %p560_p2 }
  0x29   :  { %568 = shalt.err (!%p565_p4)
}
  0x2a   :  { %s569_s14 = scalar_lea.vmem %s45_s18, 1024  ;;  %p574_p6 = scmp.lt.s32.totalorder %s45_s18, %s45_s18 }
  0x2b   :  { %p570_p5 = scmp.ne.s32.totalorder %s45_s18, %s569_s14  ;;  %p575_p7 = scmp.lt.s32.totalorder %s569_s14, %s569_s14 }
  0x2d   :  { %p576_p8 = por %p575_p7, %p574_p6 }
  0x2f   :  { %p577_p9 = pnand %p576_p8, %p570_p5 }
  0x31   :  { %580 = shalt.err (!%p577_p9)
}
  0x32   :  { %50 = dma.hbm_to_vmem [thread:$0]  %s732_s3, 1024, %s45_s18, [#allocation5], %s610_s11, %s610_s11, %s611_s12  }
  0x33   :  { %s614_s16 = smov [#allocation7]   ;;  %s581_s21 = scalar_lea.hbm %s734_s5, 2048 }
  0x34   :  { %s58_s17 = sshll.u32 %s614_s16, 4  ;;  %p582_p10 = scmp.ne.s32.totalorder %s734_s5, %s581_s21  ;;  %s59_s17 = int_to_ptr.vmem [resolvable:$true] %s58_s17 }
  0x35   :  { %p585_p11 = scmp.lt.u32.totalorder %s581_s21, %s734_s5 }
  0x37   :  { %p587_p12 = pnand %p585_p11, %p582_p10 }
  0x39   :  { %590 = shalt.err (!%p587_p12)
}
  0x3a   :  { %s591_s1 = scalar_lea.vmem %s59_s17, 2048  ;;  %p596_p0 = scmp.lt.s32.totalorder %s59_s17, %s59_s17 }
  0x3b   :  { %p592_p13 = scmp.ne.s32.totalorder %s59_s17, %s591_s1  ;;  %p597_p1 = scmp.lt.s32.totalorder %s591_s1, %s591_s1 }
  0x3d   :  { %p598_p2 = por %p597_p1, %p596_p0 }
  0x3f   :  { %p599_p3 = pnand %p598_p2, %p592_p13 }
  0x41   :  { %602 = shalt.err (!%p599_p3)
}
  0x42   :  { %s615_s3 = smov 128   ;;  %s616_s11 = smov 8  }
  0x43   :  { %64 = dma.hbm_to_vmem [thread:$0]  %s734_s5, 2048, %s59_s17, [#allocation8], %s615_s3, %s615_s3, %s616_s11  }
  0x44   :  { %603 = dma.done.wait [#allocation3], 128  }
  0x45   :  { %604 = vsyncadd [#allocation3], 4294967168 }
  0x46   :  { %605 = dma.done.wait [#allocation5], 1280  }
  0x47   :  { %606 = vsyncadd [#allocation5], 4294966016 }
  0x48   :  { %607 = dma.done.wait [#allocation8], 2048  }
  0x49   :  { %608 = vsyncadd [#allocation8], 4294965248  ;;  %v617_v0 = vmov 0.0   ;;  %vm618_vm0 = vmmov 0   ;;  %v505_v1 = vld [vmem:[#allocation4] sm:$0xff]   ;;  %v506_v2 = vld [vmem:[#allocation4 + $0x8] sm:$0xff]  }
  0x4a   :  { %407 = vmatprep.subr.bf16.mxu0 %v617_v0  ;;  %411 = vmatprep.mubr.msk.bf16.mxu0 %vm618_vm0, %v617_v0  ;;  %v80_v3 = vld [vmem:[#allocation2] sm:$0xff]  ;;  %v507_v4 = vld [vmem:[#allocation6] sm:$0xff]   ;;  %vm105_vm1 = vcmask 261120   ;;  %v509_v7 = vld [vmem:[#allocation6 + $0x10] sm:$0xff]   ;;  %v619_v16 = vmov 0.0|0.0  }
  0x4b   :  { %415 = vmatprep.subr.bf16.mxu1 %v617_v0  ;;  %431 = vmatprep.mubr.msk.bf16.mxu1 %vm618_vm0, %v617_v0  ;;  %v81_v5 = vpack.c.bf16 %v80_v3, %v80_v3  ;;  %v508_v6 = vld [vmem:[#allocation6 + $0x8] sm:$0xff]   ;;  %v510_v8 = vld [vmem:[#allocation6 + $0x18] sm:$0xff]   ;;  %v511_v9 = vld [vmem:[#allocation6 + $0x20] sm:$0xff]  }
  0x4c   :  { %408 = vmatpush3.bf16.msra.mxu0 %v505_v1  ;;  %416 = vmatpush3.bf16.msra.mxu1 %v507_v4  ;;  %v512_v10 = vld [vmem:[#allocation6 + $0x28] sm:$0xff]   ;;  %v513_v11 = vld [vmem:[#allocation6 + $0x30] sm:$0xff]   ;;  %v514_v12 = vld [vmem:[#allocation6 + $0x38] sm:$0xff]  }
  0x4d   :  { %409 = vmatprep.subr.bf16.mxu0 %v617_v0  ;;  %417 = vmatprep.subr.bf16.mxu1 %v617_v0  ;;  %v263_v13 = vld [vmem:[#allocation7] sm:$0xff]  ;;  %v264_v14 = vld [vmem:[#allocation7 + $0x8] sm:$0xff]  ;;  %v265_v15 = vld [vmem:[#allocation7 + $0x10] sm:$0xff] }
  0x4e   :  { %v471_v17 = vpack.c.bf16 %v264_v14, %v263_v13  ;;  %v266_v18 = vld [vmem:[#allocation7 + $0x18] sm:$0xff]  ;;  %v267_v20 = vld [vmem:[#allocation7 + $0x20] sm:$0xff]  ;;  %v268_v21 = vld [vmem:[#allocation7 + $0x28] sm:$0xff] }
  0x4f   :  { %v474_v19 = vpack.c.bf16 %v266_v18, %v265_v15  ;;  %v477_v22 = vpack.c.bf16 %v268_v21, %v267_v20  ;;  %v269_v23 = vld [vmem:[#allocation7 + $0x30] sm:$0xff]  ;;  %v270_v24 = vld [vmem:[#allocation7 + $0x38] sm:$0xff]  ;;  %v271_v26 = vld [vmem:[#allocation7 + $0x40] sm:$0xff] }
  0x50   :  { %410 = vmatpush3.bf16.msra.mxu0 %v506_v2  ;;  %418 = vmatpush3.bf16.msra.mxu1 %v508_v6  ;;  %v480_v25 = vpack.c.bf16 %v270_v24, %v269_v23  ;;  %v272_v27 = vld [vmem:[#allocation7 + $0x48] sm:$0xff]  ;;  %v273_v29 = vld [vmem:[#allocation7 + $0x50] sm:$0xff]  ;;  %v274_v30 = vld [vmem:[#allocation7 + $0x58] sm:$0xff] }
  0x51   :  { %419 = vmatprep.subr.bf16.mxu1 %v617_v0  ;;  %470 = vmatprep.subr.bf16.mxu0 %v619_v16  ;;  %v483_v28 = vpack.c.bf16 %v272_v27, %v271_v26  ;;  %v486_v31 = vpack.c.bf16 %v274_v30, %v273_v29  ;;  %v275_v32 = vld [vmem:[#allocation7 + $0x60] sm:$0xff]  ;;  %v276_v33 = vld [vmem:[#allocation7 + $0x68] sm:$0xff]  ;;  %v277_v43 = vld [vmem:[#allocation7 + $0x70] sm:$0xff] }
  0x52   :  { %v489_v34 = vpack.c.bf16 %v276_v33, %v275_v32  ;;  %v364_v35 = vld [vmem:[%s731_s2] ss:$0 sm:$0xff]  ;;  %v278_v44 = vld [vmem:[#allocation7 + $0x78] sm:$0xff] }
  0x53   :  { %412 = vmatmul.mubr.msk.bf16.vlgmr.msra.gmra.mrb[0].mxu0 %vm105_vm1, %v81_v5  ;;  %v492_v45 = vpack.c.bf16 %v278_v44, %v277_v43  ;;  %v368_v46 = vld [vmem:[%s733_s4] ss:$0 sm:$0xff] }
  0x54   :  { %467 = vmatprep.mubr.msk.f32.mxu0 %vm618_vm0, %v617_v0  ;;  %420 = vmatpush3.bf16.msra.mxu1 %v509_v7  ;;  %v377_v53 = vld [vmem:[%s735_s6] ss:$0 sm:$0xff] }
  0x55   :  { %421 = vmatprep.subr.bf16.mxu1 %v617_v0  ;;  %472 = vmatpush3.bf16.msra.mxu0 %v471_v17 }
  0x56   :  { %473 = vmatprep.subr.bf16.mxu0 %v619_v16 }
  0x58   :  { %422 = vmatpush3.bf16.msra.mxu1 %v510_v8 }
  0x59   :  { %423 = vmatprep.subr.bf16.mxu1 %v617_v0  ;;  %475 = vmatpush3.bf16.msra.mxu0 %v474_v19 }
  0x5a   :  { %476 = vmatprep.subr.bf16.mxu0 %v619_v16 }
  0x5c   :  { %424 = vmatpush3.bf16.msra.mxu1 %v511_v9 }
  0x5d   :  { %425 = vmatprep.subr.bf16.mxu1 %v617_v0  ;;  %478 = vmatpush3.bf16.msra.mxu0 %v477_v22 }
  0x5e   :  { %479 = vmatprep.subr.bf16.mxu0 %v619_v16 }
  0x60   :  { %426 = vmatpush3.bf16.msra.mxu1 %v512_v10 }
  0x61   :  { %427 = vmatprep.subr.bf16.mxu1 %v617_v0  ;;  %481 = vmatpush3.bf16.msra.mxu0 %v480_v25 }
  0x62   :  { %482 = vmatprep.subr.bf16.mxu0 %v619_v16 }
  0x64   :  { %428 = vmatpush3.bf16.msra.mxu1 %v513_v11 }
  0x65   :  { %429 = vmatprep.subr.bf16.mxu1 %v617_v0  ;;  %484 = vmatpush3.bf16.msra.mxu0 %v483_v28 }
  0x66   :  { %485 = vmatprep.subr.bf16.mxu0 %v619_v16 }
  0x68   :  { %430 = vmatpush3.bf16.msra.mxu1 %v514_v12 }
  0x69   :  { %487 = vmatpush3.bf16.msra.mxu0 %v486_v31 }
  0x6a   :  { %488 = vmatprep.subr.bf16.mxu0 %v619_v16 }
  0x6d   :  { %490 = vmatpush3.bf16.msra.mxu0 %v489_v34 }
  0x6e   :  { %491 = vmatprep.subr.bf16.mxu0 %v619_v16 }
  0x71   :  { %493 = vmatpush3.bf16.msra.mxu0 %v492_v45 }
 0x126   :  { %v143_v36 = vpop.f32.mrb[0].mxu0 }
 0x127   :  { %v144_v37 = vadd.f32 %v364_v35, %v143_v36  ;;  %v413_v38 = vpop.f32.mrb[1].mxu0 }
 0x128   :  { %v146_v39 = vpop.f32.mrb[2].mxu0 }
 0x129   :  { %v149_v40 = vmax.f32 %v144_v37, 0.0  ;;  %v414_v41 = vpop.f32.mrb[3].mxu0 }
 0x12b   :  { %v150_v42 = vpack.c.bf16 %v149_v40, %v149_v40 }
 0x12d   :  { %432 = vmatmul.mubr.bf16.vlgmr.msra.gmra.mrb[0].mxu1 %v150_v42 }
 0x200   :  { %v256_v47 = vpop.f32.mrb[0].mxu1 }
 0x201   :  { %v257_v48 = vadd.f32 %v368_v46, %v256_v47  ;;  %v433_v49 = vpop.f32.mrb[1].mxu1 }
 0x202   :  { %v259_v50 = vpop.f32.mrb[2].mxu1 }
 0x203   :  { %v262_v51 = vmax.f32 %v257_v48, 0.0  ;;  %v434_v52 = vpop.f32.mrb[3].mxu1 }
 0x205   :  { %468 = vmatmul.mubr.f32.vlgmr.msra.gmra.mrb[4].mxu0 %v262_v51 }
 0x2d8   :  { %v352_v54 = vpop.f32.mrb[4].mxu0 }
 0x2d9   :  { %v353_v55 = vadd.f32 %v377_v53, %v352_v54  ;;  %v469_v56 = vpop.f32.mrb[5].mxu0 }
 0x2db   :  { %356 = vst [vmem:[%s736_s7] sm:$0xff] %v353_v55 }
 0x2dc   :  { %361 = vsyncpa [#allocation3], 1 }
 0x2dd   :  { %362 = vsyncpa [#allocation5], 1 }
 0x2de   :  { %363 = vsyncpa [#allocation8], 1 }

</bundles_post_ra>
